<compile_context>
chip_gen: v7x
topology: tpu7x:2x2x1
jax: 0.10.0
libtpu: 0.0.40
codegen_flags: <defaults>
</compile_context>

<pallas_src>
import functools

import jax
import jax.numpy as jnp
from jax.experimental import pallas as pl
from jax.experimental.pallas import tpu as pltpu


def _round_up(x, m):
    return ((x + m - 1) // m) * m


def graphsage_kernel(a_ref, xk_ref, xi_ref, w_self_ref, w_neigh_ref, w_cls_ref,
                     out_ref, neigh_acc):
    """Fused GraphSAGE forward for one (row_tile, neighbor_tile) grid step.

    a_ref       : [TILE_N, TILE_K] bf16  adjacency tile (row-normalized, mean aggregator)
    xk_ref      : [TILE_K, F]      bf16  node features for this neighbor-column tile
    xi_ref      : [TILE_N, F]      bf16  node features for this row tile (self features)
    w_self_ref  : [F, E]           bf16  encoder weight (self half), transposed, resident
    w_neigh_ref : [F, E]           bf16  encoder weight (neighbor half), transposed, resident
    w_cls_ref   : [E, C_pad]       bf16  classifier weight, transposed, lane-padded, resident
    out_ref     : [TILE_N, C_pad]  f32   scores.t() (lane-dense padded slab)
    neigh_acc   : [TILE_N, F]      f32   VMEM scratch: partial mean-aggregated neighbors
    """
    k = pl.program_id(1)

    @pl.when(k == 0)
    def _():
        neigh_acc[...] = jnp.zeros_like(neigh_acc)

    # Partial mean-aggregation: accumulate this neighbor-column slice of A @ X.
    neigh_acc[...] += jnp.dot(a_ref[...], xk_ref[...],
                              preferred_element_type=jnp.float32)

    @pl.when(k == pl.num_programs(1) - 1)
    def _():
        # Encoder (concat eliminated): relu(x_self @ W_self^T + neigh @ W_neigh^T)
        h = jnp.dot(xi_ref[...], w_self_ref[...],
                    preferred_element_type=jnp.float32)
        h += jnp.dot(neigh_acc[...].astype(jnp.bfloat16), w_neigh_ref[...],
                     preferred_element_type=jnp.float32)
        h = jnp.maximum(h, 0.0)
        # Classifier: scores.t() = embeds.T @ W_cls^T  (lane-dense padded store)
        out_ref[...] = jnp.dot(h.astype(jnp.bfloat16), w_cls_ref[...],
                               preferred_element_type=jnp.float32)


@functools.partial(jax.jit, static_argnames=())
def supervised_graphsage_forward(x, adj_norm, w_enc, w_cls):
    """x:[N,F], adj_norm:[N,N], w_enc:[E,2F], w_cls:[C,E] -> scores.t():[N,C]."""
    n, f = x.shape
    e, f2 = w_enc.shape
    assert f2 == 2 * f, "encoder weight must be [E, 2F] (gcn=False concat layout)"
    c = w_cls.shape[0]

    # Split encoder weight: first F input columns act on self feats, last F on the
    # mean-aggregated neighbor feats.  Pre-transpose so the kernel does row-major dots.
    w_self_t = jnp.asarray(w_enc[:, :f]).T.astype(jnp.bfloat16)    # [F, E]
    w_neigh_t = jnp.asarray(w_enc[:, f:]).T.astype(jnp.bfloat16)   # [F, E]

    # Lane-dense classifier output: pad classes up to 128 lanes.
    c_pad = _round_up(c, 128)
    w_cls_t = jnp.zeros((e, c_pad), jnp.float32).at[:, :c].set(jnp.asarray(w_cls).T)
    w_cls_t = w_cls_t.astype(jnp.bfloat16)                         # [E, C_pad]

    # Tile sizes -- sized with headroom for v7x's 64 MiB VMEM; shrink for small problems.
    if n <= 256:
        n_pad = _round_up(n, 128)
        tile_n = tile_k = n_pad
    else:
        tile_n, tile_k = 256, 512
        n_pad = _round_up(n, 512)

    # Zero-pad nodes; padded rows/cols contribute exactly zero everywhere.
    x_p = jnp.zeros((n_pad, f), jnp.bfloat16).at[:n, :].set(x.astype(jnp.bfloat16))
    a_p = jnp.zeros((n_pad, n_pad), jnp.bfloat16).at[:n, :n].set(
        adj_norm.astype(jnp.bfloat16))

    grid = (n_pad // tile_n, n_pad // tile_k)

    out = pl.pallas_call(
        graphsage_kernel,
        out_shape=jax.ShapeDtypeStruct((n_pad, c_pad), jnp.float32),
        grid_spec=pltpu.PrefetchScalarGridSpec(
            num_scalar_prefetch=0,
            grid=grid,
            in_specs=[
                pl.BlockSpec((tile_n, tile_k), lambda i, k: (i, k)),  # A tile (pipelined)
                pl.BlockSpec((tile_k, f), lambda i, k: (k, 0)),       # X, neighbor rows
                pl.BlockSpec((tile_n, f), lambda i, k: (i, 0)),       # X, self rows
                pl.BlockSpec((f, e), lambda i, k: (0, 0)),            # W_self^T  (resident)
                pl.BlockSpec((f, e), lambda i, k: (0, 0)),            # W_neigh^T (resident)
                pl.BlockSpec((e, c_pad), lambda i, k: (0, 0)),        # W_cls^T   (resident)
            ],
            out_specs=pl.BlockSpec((tile_n, c_pad), lambda i, k: (i, 0)),
            scratch_shapes=[pltpu.VMEM((tile_n, f), jnp.float32)],
        ),
        compiler_params=pltpu.CompilerParams(
            dimension_semantics=("parallel", "arbitrary")),
    )(a_p, x_p, x_p, w_self_t, w_neigh_t, w_cls_t)

    return out[:n, :c]


def xavier_uniform(key, shape):
    fan_out, fan_in = shape
    bound = jnp.sqrt(6.0 / (fan_in + fan_out))
    return jax.random.uniform(key, shape, jnp.float32, -bound, bound)


def _build_case(key, n, f, e, c):
    k_x, k_adj, k_enc, k_cls = jax.random.split(key, 4)
    x = jax.random.normal(k_x, (n, f), jnp.float32)
    # Random graph with self-loops, row-normalized (mean aggregator, full neighborhood).
    adj = (jax.random.uniform(k_adj, (n, n)) < 0.3).astype(jnp.float32)
    adj = jnp.maximum(adj, jnp.eye(n, dtype=jnp.float32))
    adj_norm = adj / jnp.sum(adj, axis=1, keepdims=True)
    w_enc = xavier_uniform(k_enc, (e, 2 * f))
    w_cls = xavier_uniform(k_cls, (c, e))
    return x, adj_norm, w_enc, w_cls


if __name__ == "__main__":
    F, E, C = 16, 32, 4
    key = jax.random.PRNGKey(0)
    k_small, k_large = jax.random.split(key)

    # Two cases: tiny (single grid step) and multi-tile (exercises the (i, k) grid
    # and the k-axis accumulator: n=600 -> n_pad=1024, grid=(4, 2)).
    for case_key, n in ((k_small, 8), (k_large, 600)):
        x, adj_norm, w_enc, w_cls = _build_case(case_key, n, F, E, C)

        scores_t = supervised_graphsage_forward(x, adj_norm, w_enc, w_cls)
        scores_t = jax.block_until_ready(scores_t)
        assert scores_t.shape == (n, C)

        # Reference 1: mirrors the kernel's bf16 rounding points, f32 accumulation.
        xb = x.astype(jnp.bfloat16)
        ab = adj_norm.astype(jnp.bfloat16)
        ws = w_enc[:, :F].astype(jnp.bfloat16)   # (E, F)
        wn = w_enc[:, F:].astype(jnp.bfloat16)   # (E, F)
        wc = w_cls.astype(jnp.bfloat16)          # (C, E)
        neigh = jnp.dot(ab, xb, preferred_element_type=jnp.float32)
        h = (jnp.dot(xb, ws.T, preferred_element_type=jnp.float32)
             + jnp.dot(neigh.astype(jnp.bfloat16), wn.T,
                       preferred_element_type=jnp.float32))
        h = jnp.maximum(h, 0.0)
        ref_bf16 = jnp.dot(h.astype(jnp.bfloat16), wc.T,
                           preferred_element_type=jnp.float32)
        assert jnp.allclose(scores_t, ref_bf16, atol=1e-2, rtol=1e-2)

        # Reference 2: full-f32 PyTorch-equivalent math (looser tol: inputs were bf16).
        neigh_f = adj_norm @ x
        combined = jnp.concatenate([x, neigh_f], axis=1)
        embeds = jnp.maximum(w_enc @ combined.T, 0.0)   # (E, N), as PyTorch enc returns
        ref_f32 = (w_cls @ embeds).T                    # scores.t()
        assert jnp.allclose(scores_t, ref_f32, atol=1e-1, rtol=1e-1)

    print("KERNEL_OK")
</pallas_src>

<mosaic_0001>
module attributes {stable_mosaic.version = 11 : i64} {
  func.func @graphsage_kernel(%arg0: i32, %arg1: i32, %arg2: memref<128x128xbf16, #tpu.memory_space<vmem>>, %arg3: memref<128x16xbf16, #tpu.memory_space<vmem>>, %arg4: memref<128x16xbf16, #tpu.memory_space<vmem>>, %arg5: memref<16x32xbf16, #tpu.memory_space<vmem>>, %arg6: memref<16x32xbf16, #tpu.memory_space<vmem>>, %arg7: memref<32x128xbf16, #tpu.memory_space<vmem>>, %arg8: memref<128x128xf32, #tpu.memory_space<vmem>>, %arg9: memref<128x16xf32, #tpu.memory_space<vmem>>) attributes {dimension_semantics = [#tpu.dimension_semantics<parallel>, #tpu.dimension_semantics<arbitrary>], iteration_bounds = array<i64: 1, 1>, scalar_prefetch = 0 : i64, scratch_operands = 1 : i64, tpu.core_type = #tpu.core_type<tc>, window_params = [{transform_indices = @transform_0, window_bounds = array<i64: 128, 128>}, {transform_indices = @transform_1, window_bounds = array<i64: 128, 16>}, {transform_indices = @transform_2, window_bounds = array<i64: 128, 16>}, {pipeline_mode = #tpu.pipeline_mode<synchronous>, transform_indices = @transform_3, window_bounds = array<i64: 16, 32>}, {pipeline_mode = #tpu.pipeline_mode<synchronous>, transform_indices = @transform_4, window_bounds = array<i64: 16, 32>}, {pipeline_mode = #tpu.pipeline_mode<synchronous>, transform_indices = @transform_5, window_bounds = array<i64: 32, 128>}, {transform_indices = @transform_6, window_bounds = array<i64: 128, 128>}]} {
    %c0_i32 = arith.constant 0 : i32
    %0 = arith.cmpi eq, %arg1, %c0_i32 : i32
    %1 = arith.extui %0 : i1 to i32
    %c0_i32_0 = arith.constant 0 : i32
    %2 = arith.cmpi ne, %1, %c0_i32_0 : i32
    scf.if %2 {
      %cst_10 = arith.constant 0.000000e+00 : f32
      %12 = vector.broadcast %cst_10 : f32 to vector<128x16xf32>
      %c0_11 = arith.constant 0 : index
      %c0_12 = arith.constant 0 : index
      %13 = vector.load %arg9[%c0_11, %c0_12] : memref<128x16xf32, #tpu.memory_space<vmem>>, vector<128x16xf32>
      tpu.vector_store %arg9[%c0_11, %c0_12], %12 {strides = array<i32>} : memref<128x16xf32, #tpu.memory_space<vmem>>, vector<128x16xf32>,
    } else {
    }
    %c0 = arith.constant 0 : index
    %c0_1 = arith.constant 0 : index
    %3 = vector.load %arg9[%c0, %c0_1] : memref<128x16xf32, #tpu.memory_space<vmem>>, vector<128x16xf32>
    %c0_2 = arith.constant 0 : index
    %c0_3 = arith.constant 0 : index
    %4 = vector.load %arg2[%c0_2, %c0_3] : memref<128x128xbf16, #tpu.memory_space<vmem>>, vector<128x128xbf16>
    %c0_4 = arith.constant 0 : index
    %c0_5 = arith.constant 0 : index
    %5 = vector.load %arg3[%c0_4, %c0_5] : memref<128x16xbf16, #tpu.memory_space<vmem>>, vector<128x16xbf16>
    %cst = arith.constant dense<0.000000e+00> : vector<128x16xf32>
    %6 = tpu.matmul %4, %5, %cst {dimension_numbers = #tpu.dot_dimension_numbers<[1], [0], [0], [1], [0, 0, 1, 1], [], []>} : vector<128x128xbf16>, vector<128x16xbf16>, vector<128x16xf32> -> vector<128x16xf32>
    %7 = arith.addf %3, %6 : vector<128x16xf32>
    %c0_6 = arith.constant 0 : index
    %c0_7 = arith.constant 0 : index
    %8 = vector.load %arg9[%c0_6, %c0_7] : memref<128x16xf32, #tpu.memory_space<vmem>>, vector<128x16xf32>
    tpu.vector_store %arg9[%c0_6, %c0_7], %7 {strides = array<i32>} : memref<128x16xf32, #tpu.memory_space<vmem>>, vector<128x16xf32>,
    %c0_i32_8 = arith.constant 0 : i32
    %9 = arith.cmpi eq, %arg1, %c0_i32_8 : i32
    %10 = arith.extui %9 : i1 to i32
    %c0_i32_9 = arith.constant 0 : i32
    %11 = arith.cmpi ne, %10, %c0_i32_9 : i32
    scf.if %11 {
      %c0_10 = arith.constant 0 : index
      %c0_11 = arith.constant 0 : index
      %12 = vector.load %arg4[%c0_10, %c0_11] : memref<128x16xbf16, #tpu.memory_space<vmem>>, vector<128x16xbf16>
      %c0_12 = arith.constant 0 : index
      %c0_13 = arith.constant 0 : index
      %13 = vector.load %arg5[%c0_12, %c0_13] : memref<16x32xbf16, #tpu.memory_space<vmem>>, vector<16x32xbf16>
      %cst_14 = arith.constant dense<0.000000e+00> : vector<128x32xf32>
      %14 = tpu.matmul %12, %13, %cst_14 {dimension_numbers = #tpu.dot_dimension_numbers<[1], [0], [0], [1], [0, 0, 1, 1], [], []>} : vector<128x16xbf16>, vector<16x32xbf16>, vector<128x32xf32> -> vector<128x32xf32>
      %c0_15 = arith.constant 0 : index
      %c0_16 = arith.constant 0 : index
      %15 = vector.load %arg9[%c0_15, %c0_16] : memref<128x16xf32, #tpu.memory_space<vmem>>, vector<128x16xf32>
      %16 = arith.truncf %15 : vector<128x16xf32> to vector<128x16xbf16>
      %c0_17 = arith.constant 0 : index
      %c0_18 = arith.constant 0 : index
      %17 = vector.load %arg6[%c0_17, %c0_18] : memref<16x32xbf16, #tpu.memory_space<vmem>>, vector<16x32xbf16>
      %cst_19 = arith.constant dense<0.000000e+00> : vector<128x32xf32>
      %18 = tpu.matmul %16, %17, %cst_19 {dimension_numbers = #tpu.dot_dimension_numbers<[1], [0], [0], [1], [0, 0, 1, 1], [], []>} : vector<128x16xbf16>, vector<16x32xbf16>, vector<128x32xf32> -> vector<128x32xf32>
      %19 = arith.addf %14, %18 : vector<128x32xf32>
      %cst_20 = arith.constant 0.000000e+00 : f32
      %20 = vector.broadcast %cst_20 : f32 to vector<128x32xf32>
      %21 = arith.maximumf %19, %20 : vector<128x32xf32>
      %22 = arith.truncf %21 : vector<128x32xf32> to vector<128x32xbf16>
      %c0_21 = arith.constant 0 : index
      %c0_22 = arith.constant 0 : index
      %23 = vector.load %arg7[%c0_21, %c0_22] : memref<32x128xbf16, #tpu.memory_space<vmem>>, vector<32x128xbf16>
      %cst_23 = arith.constant dense<0.000000e+00> : vector<128x128xf32>
      %24 = tpu.matmul %22, %23, %cst_23 {dimension_numbers = #tpu.dot_dimension_numbers<[1], [0], [0], [1], [0, 0, 1, 1], [], []>} : vector<128x32xbf16>, vector<32x128xbf16>, vector<128x128xf32> -> vector<128x128xf32>
      %c0_24 = arith.constant 0 : index
      %c0_25 = arith.constant 0 : index
      %25 = vector.load %arg8[%c0_24, %c0_25] : memref<128x128xf32, #tpu.memory_space<vmem>>, vector<128x128xf32>
      tpu.vector_store %arg8[%c0_24, %c0_25], %24 {strides = array<i32>} : memref<128x128xf32, #tpu.memory_space<vmem>>, vector<128x128xf32>,
    } else {
    }
    return
  }
  func.func @transform_0(%arg0: i32, %arg1: i32) -> (i32, i32) {
    %c0_i32 = arith.constant 0 : i32
    return %arg0, %arg1 : i32, i32
  }
  func.func @transform_1(%arg0: i32, %arg1: i32) -> (i32, i32) {
    %c0_i32 = arith.constant 0 : i32
    %c0_i32_0 = arith.constant 0 : i32
    return %arg1, %c0_i32 : i32, i32
  }
  func.func @transform_2(%arg0: i32, %arg1: i32) -> (i32, i32) {
    %c0_i32 = arith.constant 0 : i32
    %c0_i32_0 = arith.constant 0 : i32
    return %arg0, %c0_i32 : i32, i32
  }
  func.func @transform_3(%arg0: i32, %arg1: i32) -> (i32, i32) {
    %c0_i32 = arith.constant 0 : i32
    %c0_i32_0 = arith.constant 0 : i32
    %c0_i32_1 = arith.constant 0 : i32
    return %c0_i32, %c0_i32_0 : i32, i32
  }
  func.func @transform_4(%arg0: i32, %arg1: i32) -> (i32, i32) {
    %c0_i32 = arith.constant 0 : i32
    %c0_i32_0 = arith.constant 0 : i32
    %c0_i32_1 = arith.constant 0 : i32
    return %c0_i32, %c0_i32_0 : i32, i32
  }
  func.func @transform_5(%arg0: i32, %arg1: i32) -> (i32, i32) {
    %c0_i32 = arith.constant 0 : i32
    %c0_i32_0 = arith.constant 0 : i32
    %c0_i32_1 = arith.constant 0 : i32
    return %c0_i32, %c0_i32_0 : i32, i32
  }
  func.func @transform_6(%arg0: i32, %arg1: i32) -> (i32, i32) {
    %c0_i32 = arith.constant 0 : i32
    %c0_i32_0 = arith.constant 0 : i32
    return %arg0, %c0_i32 : i32, i32
  }
}

</mosaic_0001>

<bundles_post_ra>
// kernel: supervised_graphsage_forward.1
= control target key start
LH: loop header
LB: loop body
LE: loop exit
PB: predicated region body
PF: predicated region fallthrough
CT: control target
= control target key end

     0   :  { %vm28_vm0 = vcmask 130048   ;;  %v1075_v1 = vmov 0.0   ;;  %vm700_vm1 = vcmask 261120   ;;  %s1305_s1 = inlined_call_operand.vmem [shape: bf16[128,16], index: 1, kind: input, shape index: {}, may-alias: {1,2}]   ;;  %s1306_s0 = inlined_call_operand.vmem [shape: bf16[128,128], index: 0, kind: input, shape index: {}]   ;;  %s1307_s4 = inlined_call_operand.vmem [shape: bf16[16,32], index: 4, kind: input, shape index: {}]   ;;  %s1308_s3 = inlined_call_operand.vmem [shape: bf16[16,32], index: 3, kind: input, shape index: {}]   ;;  %s1309_s2 = inlined_call_operand.vmem [shape: bf16[128,16], index: 2, kind: input, shape index: {}, may-alias: {1,2}]   ;;  %s1310_s5 = inlined_call_operand.vmem [shape: bf16[32,128], index: 5, kind: input, shape index: {}]   ;;  %s1311_s6 = inlined_call_operand.vmem [shape: f32[128,128], index: 6, kind: output, shape index: {}]  }
   0x1   :  { %v1047_v0 = vld [vmem:[%s1305_s1] sm:$0xff]   ;;  %31 = vst.msk [vmem:[#allocation2 + $0x10] sm:$0xff] %vm28_vm0, %v1075_v1  ;;  %29 = vst.msk [vmem:[#allocation2] sm:$0xff] %vm28_vm0, %v1075_v1  ;;  %v1048_v2 = vld [vmem:[%s1305_s1 + $0x8] sm:$0xff]  }
   0x2   :  { %30 = vst.msk [vmem:[#allocation2 + $0x8] sm:$0xff] %vm28_vm0, %v1075_v1  ;;  %32 = vst.msk [vmem:[#allocation2 + $0x18] sm:$0xff] %vm28_vm0, %v1075_v1  ;;  %938 = vmatprep.subr.bf16.mxu0 %v1047_v0  ;;  %v1049_v3 = vld [vmem:[%s1305_s1 + $0x10] sm:$0xff]   ;;  %v1050_v4 = vld [vmem:[%s1305_s1 + $0x18] sm:$0xff]  }
   0x3   :  { %33 = vst.msk [vmem:[#allocation2 + $0x20] sm:$0xff] %vm28_vm0, %v1075_v1  ;;  %34 = vst.msk [vmem:[#allocation2 + $0x28] sm:$0xff] %vm28_vm0, %v1075_v1  ;;  %939 = vmatpush3.bf16.msra.mxu0 %v1047_v0  ;;  %v1055_v5 = vld [vmem:[%s1306_s0] sm:$0xff]   ;;  %v1052_v7 = vld [vmem:[%s1305_s1 + $0x28] sm:$0xff]  }
   0x4   :  { %35 = vst.msk [vmem:[#allocation2 + $0x30] sm:$0xff] %vm28_vm0, %v1075_v1  ;;  %36 = vst.msk [vmem:[#allocation2 + $0x38] sm:$0xff] %vm28_vm0, %v1075_v1  ;;  %940 = vmatprep.subr.bf16.mxu0 %v1048_v2  ;;  %954 = vmatprep.mubr.bf16.mxu0 %v1055_v5  ;;  %v1051_v6 = vld [vmem:[%s1305_s1 + $0x20] sm:$0xff]   ;;  %v1053_v8 = vld [vmem:[%s1305_s1 + $0x30] sm:$0xff]  }
   0x5   :  { %37 = vst.msk [vmem:[#allocation2 + $0x40] sm:$0xff] %vm28_vm0, %v1075_v1  ;;  %38 = vst.msk [vmem:[#allocation2 + $0x48] sm:$0xff] %vm28_vm0, %v1075_v1  ;;  %v1054_v9 = vld [vmem:[%s1305_s1 + $0x38] sm:$0xff]   ;;  %v1056_v10 = vld [vmem:[%s1306_s0 + $0x8] sm:$0xff]  }
   0x6   :  { %39 = vst.msk [vmem:[#allocation2 + $0x50] sm:$0xff] %vm28_vm0, %v1075_v1  ;;  %40 = vst.msk [vmem:[#allocation2 + $0x58] sm:$0xff] %vm28_vm0, %v1075_v1  ;;  %v1057_v11 = vld [vmem:[%s1306_s0 + $0x10] sm:$0xff]   ;;  %v1058_v12 = vld [vmem:[%s1306_s0 + $0x18] sm:$0xff]  }
   0x7   :  { %41 = vst.msk [vmem:[#allocation2 + $0x60] sm:$0xff] %vm28_vm0, %v1075_v1  ;;  %42 = vst.msk [vmem:[#allocation2 + $0x68] sm:$0xff] %vm28_vm0, %v1075_v1  ;;  %941 = vmatpush3.bf16.msra.mxu0 %v1048_v2  ;;  %v1059_v13 = vld [vmem:[%s1306_s0 + $0x20] sm:$0xff]   ;;  %v1060_v14 = vld [vmem:[%s1306_s0 + $0x28] sm:$0xff]  }
   0x8   :  { %43 = vst.msk [vmem:[#allocation2 + $0x70] sm:$0xff] %vm28_vm0, %v1075_v1  ;;  %44 = vst.msk [vmem:[#allocation2 + $0x78] sm:$0xff] %vm28_vm0, %v1075_v1  ;;  %942 = vmatprep.subr.bf16.mxu0 %v1049_v3  ;;  %v1061_v15 = vld [vmem:[%s1306_s0 + $0x30] sm:$0xff]   ;;  %v1062_v16 = vld [vmem:[%s1306_s0 + $0x38] sm:$0xff]  }
   0x9   :  { %v1063_v17 = vld [vmem:[%s1307_s4] sm:$0xff]   ;;  %v47_v20 = vld [vmem:[#allocation2 + $0x10] sm:$0xff]  ;;  %v48_v23 = vld [vmem:[#allocation2 + $0x18] sm:$0xff] }
   0xa   :  { %970 = vmatprep.subr.bf16.mxu1 %v1063_v17  ;;  %v1064_v18 = vld [vmem:[%s1308_s3] sm:$0xff]   ;;  %v46_v26 = vld [vmem:[#allocation2 + $0x8] sm:$0xff] }
   0xb   :  { %943 = vmatpush3.bf16.msra.mxu0 %v1049_v3  ;;  %971 = vmatpush3.bf16.msra.mxu1 %v1063_v17  ;;  %v1184_v19 = vld [vmem:[%s1310_s5] sm:$0xff]   ;;  %v51_v32 = vld [vmem:[#allocation2 + $0x30] sm:$0xff]  ;;  %v52_v35 = vld [vmem:[#allocation2 + $0x38] sm:$0xff] }
   0xc   :  { %944 = vmatprep.subr.bf16.mxu0 %v1050_v4  ;;  %988 = vmatprep.subr.bf16.mxu1 %v1064_v18  ;;  %v45_v21 = vld [vmem:[#allocation2] sm:$0xff]  ;;  %v50_v38 = vld [vmem:[#allocation2 + $0x28] sm:$0xff] }
   0xd   :  { %v49_v33 = vld [vmem:[#allocation2 + $0x20] sm:$0xff]  ;;  %v55_v47 = vld [vmem:[#allocation2 + $0x50] sm:$0xff]  ;;  %v56_v53 = vld [vmem:[#allocation2 + $0x58] sm:$0xff] }
   0xe   :  { %v53_v50 = vld [vmem:[#allocation2 + $0x40] sm:$0xff]  ;;  %v54_v56 = vld [vmem:[#allocation2 + $0x48] sm:$0xff] }
   0xf   :  { %945 = vmatpush3.bf16.msra.mxu0 %v1050_v4  ;;  %v59_v1 = vld [vmem:[#allocation2 + $0x70] sm:$0xff]  ;;  %v57_v4 = vld [vmem:[#allocation2 + $0x60] sm:$0xff] }
  0x10   :  { %946 = vmatprep.subr.bf16.mxu0 %v1051_v6 }
  0x13   :  { %947 = vmatpush3.bf16.msra.mxu0 %v1051_v6 }
  0x14   :  { %948 = vmatprep.subr.bf16.mxu0 %v1052_v7 }
  0x17   :  { %949 = vmatpush3.bf16.msra.mxu0 %v1052_v7  ;;  %v60_v7 = vld [vmem:[#allocation2 + $0x78] sm:$0xff] }
  0x18   :  { %950 = vmatprep.subr.bf16.mxu0 %v1053_v8 }
  0x1b   :  { %951 = vmatpush3.bf16.msra.mxu0 %v1053_v8 }
  0x1c   :  { %952 = vmatprep.subr.bf16.mxu0 %v1054_v9 }
  0x1f   :  { %953 = vmatpush3.bf16.msra.mxu0 %v1054_v9 }
  0x20   :  { %1006 = vmatprep.subr.bf16.mxu0 %v1184_v19 }
  0x22   :  { %955 = vmatmul.mubr.bf16.vlgmr.msra.gmra.mrb[0].mxu0 %v1056_v10  ;;  %v58_v10 = vld [vmem:[#allocation2 + $0x68] sm:$0xff] }
  0x23   :  { %958 = vmatprep.mubr.bf16.mxu0 %v1057_v11  ;;  %1007 = vmatpush3.bf16.msra.mxu0 %v1184_v19 }
  0x2a   :  { %959 = vmatmul.mubr.bf16.gmra.mrb[4].mxu0 %v1058_v12 }
  0x2b   :  { %962 = vmatprep.mubr.bf16.mxu0 %v1059_v13 }
  0x32   :  { %963 = vmatmul.mubr.bf16.gmra.mrb[8].mxu0 %v1060_v14 }
  0x33   :  { %966 = vmatprep.mubr.bf16.mxu0 %v1061_v15 }
  0x3a   :  { %967 = vmatmul.mubr.bf16.gmra.mrb[12].mxu0 %v1062_v16 }
  0xf5   :  { %v956_v22 = vpop.f32.mrb[0].mxu0 }
  0xf6   :  { %v288_v24 = vadd.f32 %v956_v22, %v47_v20  ;;  %v223_v25 = vpop.f32.mrb[1].mxu0 }
  0xf7   :  { %v286_v27 = vadd.f32 %v223_v25, %v45_v21  ;;  %v957_v28 = vpop.f32.mrb[2].mxu0 }
  0xf8   :  { %305 = vst.msk [vmem:[#allocation2 + $0x10] sm:$0xff] %vm28_vm0, %v288_v24  ;;  %v289_v29 = vadd.f32 %v957_v28, %v48_v23  ;;  %v226_v30 = vpop.f32.mrb[3].mxu0  ;;  %v1065_v28 = vld [vmem:[%s1309_s2] sm:$0xff]  }
  0xf9   :  { %303 = vst.msk [vmem:[#allocation2] sm:$0xff] %vm28_vm0, %v286_v27  ;;  %v287_v31 = vadd.f32 %v226_v30, %v46_v26  ;;  %v1066_v30 = vld [vmem:[%s1309_s2 + $0x8] sm:$0xff]  }
  0xfa   :  { %306 = vst.msk [vmem:[#allocation2 + $0x18] sm:$0xff] %vm28_vm0, %v289_v29 }
  0xfb   :  { %304 = vst.msk [vmem:[#allocation2 + $0x8] sm:$0xff] %vm28_vm0, %v287_v31  ;;  %v1067_v31 = vld [vmem:[%s1309_s2 + $0x10] sm:$0xff]  }
  0xfd   :  { %v960_v34 = vpop.f32.mrb[4].mxu0 }
  0xfe   :  { %v292_v36 = vadd.f32 %v960_v34, %v51_v32  ;;  %v239_v37 = vpop.f32.mrb[5].mxu0  ;;  %v1068_v32 = vld [vmem:[%s1309_s2 + $0x18] sm:$0xff]   ;;  %v1070_v34 = vld [vmem:[%s1309_s2 + $0x28] sm:$0xff]  }
  0xff   :  { %v290_v39 = vadd.f32 %v239_v37, %v49_v33  ;;  %v961_v40 = vpop.f32.mrb[6].mxu0  ;;  %v342_v49 = vld [vmem:[#allocation2 + $0x10] sm:$0xff]  ;;  %v1069_v33 = vld [vmem:[%s1309_s2 + $0x20] sm:$0xff]  }
 0x100   :  { %309 = vst.msk [vmem:[#allocation2 + $0x30] sm:$0xff] %vm28_vm0, %v292_v36  ;;  %v293_v41 = vadd.f32 %v961_v40, %v52_v35  ;;  %v242_v42 = vpop.f32.mrb[7].mxu0  ;;  %v340_v45 = vld [vmem:[#allocation2] sm:$0xff]  ;;  %v1072_v35 = vld [vmem:[%s1309_s2 + $0x38] sm:$0xff]   ;;  %v1074_v36 = vld [vmem:[%s1310_s5 + $0x8] sm:$0xff]  }
 0x101   :  { %307 = vst.msk [vmem:[#allocation2 + $0x20] sm:$0xff] %vm28_vm0, %v290_v39  ;;  %v291_v43 = vadd.f32 %v242_v42, %v50_v38  ;;  %v343_v44 = vld [vmem:[#allocation2 + $0x18] sm:$0xff]  ;;  %1008 = vmatprep.subr.bf16.mxu0 %v1074_v36 }
 0x102   :  { %310 = vst.msk [vmem:[#allocation2 + $0x38] sm:$0xff] %vm28_vm0, %v293_v41  ;;  %v341_v46 = vld [vmem:[#allocation2 + $0x8] sm:$0xff]  ;;  %v357_v51 = vpack.c.bf16 %v343_v44, %v342_v49  ;;  %1009 = vmatpush3.bf16.msra.mxu0 %v1074_v36 }
 0x103   :  { %308 = vst.msk [vmem:[#allocation2 + $0x28] sm:$0xff] %vm28_vm0, %v291_v43  ;;  %v356_v48 = vpack.c.bf16 %v341_v46, %v340_v45 }
 0x105   :  { %v964_v52 = vpop.f32.mrb[8].mxu0  ;;  %972 = vmatprep.mubr.msk.bf16.mxu1 %vm28_vm0, %v356_v48 }
 0x106   :  { %v296_v54 = vadd.f32 %v964_v52, %v55_v47  ;;  %v255_v55 = vpop.f32.mrb[9].mxu0  ;;  %973 = vmatmul.mubr.msk.bf16.vlgmr.msra.gmra.mrb[0].mxu1 %vm28_vm0, %v357_v51 }
 0x107   :  { %v294_v57 = vadd.f32 %v255_v55, %v53_v50  ;;  %989 = vmatpush3.bf16.msra.mxu1 %v1064_v18  ;;  %v965_v58 = vpop.f32.mrb[10].mxu0  ;;  %v346_v3 = vld [vmem:[#allocation2 + $0x30] sm:$0xff] }
 0x108   :  { %313 = vst.msk [vmem:[#allocation2 + $0x50] sm:$0xff] %vm28_vm0, %v296_v54  ;;  %v297_v59 = vadd.f32 %v965_v58, %v56_v53  ;;  %v258_v60 = vpop.f32.mrb[11].mxu0  ;;  %1026 = vmatprep.subr.bf16.mxu1 %v1184_v19  ;;  %v344_v63 = vld [vmem:[#allocation2 + $0x20] sm:$0xff] }
 0x109   :  { %311 = vst.msk [vmem:[#allocation2 + $0x40] sm:$0xff] %vm28_vm0, %v294_v57  ;;  %v295_v61 = vadd.f32 %v258_v60, %v54_v56  ;;  %v347_v62 = vld [vmem:[#allocation2 + $0x38] sm:$0xff] }
 0x10a   :  { %314 = vst.msk [vmem:[#allocation2 + $0x58] sm:$0xff] %vm28_vm0, %v297_v59  ;;  %v345_v0 = vld [vmem:[#allocation2 + $0x28] sm:$0xff]  ;;  %v359_v5 = vpack.c.bf16 %v347_v62, %v346_v3 }
 0x10b   :  { %312 = vst.msk [vmem:[#allocation2 + $0x48] sm:$0xff] %vm28_vm0, %v295_v61  ;;  %v358_v2 = vpack.c.bf16 %v345_v0, %v344_v63 }
 0x10d   :  { %v968_v6 = vpop.f32.mrb[12].mxu0  ;;  %976 = vmatprep.mubr.msk.bf16.mxu1 %vm28_vm0, %v358_v2 }
 0x10e   :  { %v300_v8 = vadd.f32 %v968_v6, %v59_v1  ;;  %v271_v9 = vpop.f32.mrb[13].mxu0  ;;  %977 = vmatmul.mubr.msk.bf16.gmra.mrb[4].mxu1 %vm28_vm0, %v359_v5 }
 0x10f   :  { %v298_v11 = vadd.f32 %v271_v9, %v57_v4  ;;  %v969_v12 = vpop.f32.mrb[14].mxu0  ;;  %v350_v21 = vld [vmem:[#allocation2 + $0x50] sm:$0xff] }
 0x110   :  { %317 = vst.msk [vmem:[#allocation2 + $0x70] sm:$0xff] %vm28_vm0, %v300_v8  ;;  %v301_v13 = vadd.f32 %v969_v12, %v60_v7  ;;  %v274_v14 = vpop.f32.mrb[15].mxu0  ;;  %v348_v17 = vld [vmem:[#allocation2 + $0x40] sm:$0xff] }
 0x111   :  { %315 = vst.msk [vmem:[#allocation2 + $0x60] sm:$0xff] %vm28_vm0, %v298_v11  ;;  %v299_v15 = vadd.f32 %v274_v14, %v58_v10  ;;  %v351_v16 = vld [vmem:[#allocation2 + $0x58] sm:$0xff] }
 0x112   :  { %318 = vst.msk [vmem:[#allocation2 + $0x78] sm:$0xff] %vm28_vm0, %v301_v13  ;;  %v349_v18 = vld [vmem:[#allocation2 + $0x48] sm:$0xff]  ;;  %v361_v22 = vpack.c.bf16 %v351_v16, %v350_v21 }
 0x113   :  { %316 = vst.msk [vmem:[#allocation2 + $0x68] sm:$0xff] %vm28_vm0, %v299_v15  ;;  %v360_v20 = vpack.c.bf16 %v349_v18, %v348_v17 }
 0x115   :  { %980 = vmatprep.mubr.msk.bf16.mxu1 %vm28_vm0, %v360_v20 }
 0x116   :  { %981 = vmatmul.mubr.msk.bf16.gmra.mrb[8].mxu1 %vm28_vm0, %v361_v22 }
 0x117   :  { %v354_v27 = vld [vmem:[#allocation2 + $0x70] sm:$0xff] }
 0x118   :  { %v352_v24 = vld [vmem:[#allocation2 + $0x60] sm:$0xff] }
 0x119   :  { %v355_v23 = vld [vmem:[#allocation2 + $0x78] sm:$0xff] }
 0x11a   :  { %v353_v25 = vld [vmem:[#allocation2 + $0x68] sm:$0xff]  ;;  %v363_v29 = vpack.c.bf16 %v355_v23, %v354_v27 }
 0x11b   :  { %v362_v26 = vpack.c.bf16 %v353_v25, %v352_v24 }
 0x11d   :  { %984 = vmatprep.mubr.msk.bf16.mxu1 %vm28_vm0, %v362_v26 }
 0x11e   :  { %985 = vmatmul.mubr.msk.bf16.gmra.mrb[12].mxu1 %vm28_vm0, %v363_v29 }
 0x11f   :  { %990 = vmatprep.mubr.msk.bf16.mxu1 %vm28_vm0, %v1065_v28 }
 0x126   :  { %991 = vmatmul.mubr.msk.bf16.vlgmr.msra.gmra.mrb[0].mxu1 %vm28_vm0, %v1066_v30 }
 0x127   :  { %994 = vmatprep.mubr.msk.bf16.mxu1 %vm28_vm0, %v1067_v31  ;;  %1028 = vmatpush3.bf16.msra.mxu1 %v1184_v19  ;;  %v1071_v19 = vld [vmem:[%s1309_s2 + $0x30] sm:$0xff]  }
 0x128   :  { %1027 = vmatprep.subr.bf16.mxu1 %v1074_v36 }
 0x12b   :  { %1029 = vmatpush3.bf16.msra.mxu1 %v1074_v36 }
 0x12e   :  { %995 = vmatmul.mubr.msk.bf16.gmra.mrb[4].mxu1 %vm28_vm0, %v1068_v32 }
 0x12f   :  { %998 = vmatprep.mubr.msk.bf16.mxu1 %vm28_vm0, %v1069_v33 }
 0x136   :  { %999 = vmatmul.mubr.msk.bf16.gmra.mrb[8].mxu1 %vm28_vm0, %v1070_v34 }
 0x137   :  { %1002 = vmatprep.mubr.msk.bf16.mxu1 %vm28_vm0, %v1071_v19 }
 0x13e   :  { %1003 = vmatmul.mubr.msk.bf16.gmra.mrb[12].mxu1 %vm28_vm0, %v1072_v35 }
 0x1f9   :  { %v992_v37 = vpop.f32.mrb[0].mxu1 }
 0x1fa   :  { %v597_v38 = vpop.f32.mrb[1].mxu1  ;;  %v662_v40 = vmax.f32 %v992_v37, 0.0 }
 0x1fb   :  { %v993_v39 = vpop.f32.mrb[2].mxu1  ;;  %v660_v43 = vmax.f32 %v597_v38, 0.0 }
 0x1fc   :  { %v663_v41 = vmax.f32 %v993_v39, 0.0  ;;  %v600_v42 = vpop.f32.mrb[3].mxu1 }
 0x1fd   :  { %v661_v44 = vmax.f32 %v600_v42, 0.0 }
 0x1fe   :  { %v677_v45 = vpack.c.bf16 %v663_v41, %v662_v40 }
 0x1ff   :  { %v676_v46 = vpack.c.bf16 %v661_v44, %v660_v43 }
 0x201   :  { %v996_v47 = vpop.f32.mrb[4].mxu1  ;;  %1010 = vmatprep.mubr.msk.bf16.mxu0 %vm700_vm1, %v676_v46 }
 0x202   :  { %v613_v48 = vpop.f32.mrb[5].mxu1  ;;  %1011 = vmatmul.mubr.msk.bf16.vlgmr.msra.gmra.mrb[16].mxu0 %vm700_vm1, %v677_v45  ;;  %v666_v50 = vmax.f32 %v996_v47, 0.0 }
 0x203   :  { %v997_v49 = vpop.f32.mrb[6].mxu1  ;;  %v664_v53 = vmax.f32 %v613_v48, 0.0 }
 0x204   :  { %v667_v51 = vmax.f32 %v997_v49, 0.0  ;;  %v616_v52 = vpop.f32.mrb[7].mxu1 }
 0x205   :  { %v665_v54 = vmax.f32 %v616_v52, 0.0 }
 0x206   :  { %v679_v55 = vpack.c.bf16 %v667_v51, %v666_v50 }
 0x207   :  { %v678_v56 = vpack.c.bf16 %v665_v54, %v664_v53 }
 0x209   :  { %v1000_v57 = vpop.f32.mrb[8].mxu1  ;;  %1014 = vmatprep.mubr.msk.bf16.mxu0 %vm700_vm1, %v678_v56 }
 0x20a   :  { %v629_v58 = vpop.f32.mrb[9].mxu1  ;;  %1015 = vmatmul.mubr.msk.bf16.gmra.mrb[20].mxu0 %vm700_vm1, %v679_v55  ;;  %v670_v60 = vmax.f32 %v1000_v57, 0.0 }
 0x20b   :  { %v1001_v59 = vpop.f32.mrb[10].mxu1  ;;  %v668_v63 = vmax.f32 %v629_v58, 0.0 }
 0x20c   :  { %v671_v61 = vmax.f32 %v1001_v59, 0.0  ;;  %v632_v62 = vpop.f32.mrb[11].mxu1 }
 0x20d   :  { %v669_v0 = vmax.f32 %v632_v62, 0.0 }
 0x20e   :  { %v681_v1 = vpack.c.bf16 %v671_v61, %v670_v60 }
 0x20f   :  { %v680_v2 = vpack.c.bf16 %v669_v0, %v668_v63 }
 0x211   :  { %v1004_v3 = vpop.f32.mrb[12].mxu1  ;;  %1018 = vmatprep.mubr.msk.bf16.mxu0 %vm700_vm1, %v680_v2 }
 0x212   :  { %v645_v4 = vpop.f32.mrb[13].mxu1  ;;  %1019 = vmatmul.mubr.msk.bf16.gmra.mrb[24].mxu0 %vm700_vm1, %v681_v1  ;;  %v674_v6 = vmax.f32 %v1004_v3, 0.0 }
 0x213   :  { %v1005_v5 = vpop.f32.mrb[14].mxu1  ;;  %v672_v9 = vmax.f32 %v645_v4, 0.0 }
 0x214   :  { %v675_v7 = vmax.f32 %v1005_v5, 0.0  ;;  %v648_v8 = vpop.f32.mrb[15].mxu1 }
 0x215   :  { %v673_v10 = vmax.f32 %v648_v8, 0.0 }
 0x216   :  { %v683_v11 = vpack.c.bf16 %v675_v7, %v674_v6 }
 0x217   :  { %v682_v12 = vpack.c.bf16 %v673_v10, %v672_v9 }
 0x219   :  { %1022 = vmatprep.mubr.msk.bf16.mxu1 %vm700_vm1, %v682_v12 }
 0x21a   :  { %1023 = vmatmul.mubr.msk.bf16.vlgmr.msra.gmra.mrb[16].mxu1 %vm700_vm1, %v683_v11 }
 0x2d5   :  { %v1012_v13 = vpop.f32.mrb[16].mxu0 }
 0x2d6   :  { %824 = vst [vmem:[%s1311_s6 + $0x10] sm:$0xff] %v1012_v13  ;;  %v759_v14 = vpop.f32.mrb[17].mxu0 }
 0x2d7   :  { %822 = vst [vmem:[%s1311_s6] sm:$0xff] %v759_v14  ;;  %v1013_v15 = vpop.f32.mrb[18].mxu0 }
 0x2d8   :  { %825 = vst [vmem:[%s1311_s6 + $0x18] sm:$0xff] %v1013_v15  ;;  %v762_v16 = vpop.f32.mrb[19].mxu0 }
 0x2d9   :  { %823 = vst [vmem:[%s1311_s6 + $0x8] sm:$0xff] %v762_v16 }
 0x2dd   :  { %v1016_v17 = vpop.f32.mrb[20].mxu0 }
 0x2de   :  { %828 = vst [vmem:[%s1311_s6 + $0x30] sm:$0xff] %v1016_v17  ;;  %v775_v18 = vpop.f32.mrb[21].mxu0 }
 0x2df   :  { %826 = vst [vmem:[%s1311_s6 + $0x20] sm:$0xff] %v775_v18  ;;  %v1017_v20 = vpop.f32.mrb[22].mxu0 }
 0x2e0   :  { %829 = vst [vmem:[%s1311_s6 + $0x38] sm:$0xff] %v1017_v20  ;;  %v778_v21 = vpop.f32.mrb[23].mxu0 }
 0x2e1   :  { %827 = vst [vmem:[%s1311_s6 + $0x28] sm:$0xff] %v778_v21 }
 0x2e5   :  { %v1020_v22 = vpop.f32.mrb[24].mxu0 }
 0x2e6   :  { %832 = vst [vmem:[%s1311_s6 + $0x50] sm:$0xff] %v1020_v22  ;;  %v791_v23 = vpop.f32.mrb[25].mxu0 }
 0x2e7   :  { %830 = vst [vmem:[%s1311_s6 + $0x40] sm:$0xff] %v791_v23  ;;  %v1021_v24 = vpop.f32.mrb[26].mxu0 }
 0x2e8   :  { %833 = vst [vmem:[%s1311_s6 + $0x58] sm:$0xff] %v1021_v24  ;;  %v794_v25 = vpop.f32.mrb[27].mxu0 }
 0x2e9   :  { %831 = vst [vmem:[%s1311_s6 + $0x48] sm:$0xff] %v794_v25 }
 0x2ed   :  { %v1024_v26 = vpop.f32.mrb[16].mxu1 }
 0x2ee   :  { %836 = vst [vmem:[%s1311_s6 + $0x70] sm:$0xff] %v1024_v26  ;;  %v807_v27 = vpop.f32.mrb[17].mxu1 }
 0x2ef   :  { %834 = vst [vmem:[%s1311_s6 + $0x60] sm:$0xff] %v807_v27  ;;  %v1025_v28 = vpop.f32.mrb[18].mxu1 }
 0x2f0   :  { %837 = vst [vmem:[%s1311_s6 + $0x78] sm:$0xff] %v1025_v28  ;;  %v810_v29 = vpop.f32.mrb[19].mxu1 }
 0x2f1   :  { %835 = vst [vmem:[%s1311_s6 + $0x68] sm:$0xff] %v810_v29 }

</bundles_post_ra>
